<compile_context>
chip_gen: v6e
topology: v6e:2x2x1
jax: 0.10.0
libtpu: 0.0.40
codegen_flags: <defaults>
</compile_context>

<pallas_src>
import functools

import jax
import jax.numpy as jnp
import numpy as np
from jax import lax
from jax.experimental import pallas as pl
from jax.experimental.pallas import tpu as pltpu


_VMEM_LIMIT = 48 * 1024 * 1024      # scoped-VMEM request: > v5e's 16 MiB default,
                                    # comfortably < v7x's 64 MiB physical VMEM
_MAX_IN_BLOCK_BYTES = 8 << 20       # f32 input block cap -> <= ~24-32 MiB double-buffered
_MAX_TILE_ROWS = 1024
_TOPK_CHUNK = 1024                  # lanes per streaming chunk in the beam kernel


# ----------------------------------------------------------------------------
# helpers
# ----------------------------------------------------------------------------
def _row_tile(n, v, itemsize=4):
    """Rows per block for the row-streaming kernels.

    * multiple of 8 (sublane aligned) that divides n
    * capped so the f32 input block stays <= _MAX_IN_BLOCK_BYTES
    * capped at n//2 when n >= 16 so the 'parallel' grid axis has >= 2 steps
      (both v7x TensorCores get work; pipeline double-buffers).
    """
    if n % 8 != 0:
        return n                    # unaligned row count -> single block
    cap = max(8, (_MAX_IN_BLOCK_BYTES // (itemsize * max(v, 1))) // 8 * 8)
    cap = min(cap, _MAX_TILE_ROWS, n)
    if n >= 16:
        cap = min(cap, max(8, (n // 2) // 8 * 8))
    cap = max(cap, 8)
    tile = cap
    while n % tile:
        tile -= 8
    return max(tile, 8)


def _beam_batches_per_block(b, bin_in):
    """Batch items per beam-kernel block: fill the 8 sublanes (8 // bin beams)
    but keep >= 2 grid steps whenever batch >= 2; must divide the batch."""
    bpb = max(1, 8 // max(bin_in, 1))
    if b >= 2:
        bpb = min(bpb, b // 2)
    bpb = max(bpb, 1)
    while b % bpb:
        bpb -= 1
    return bpb


def _topk_lane(vals, idx, k, big):
    """k passes of (max, first-index argmax) with retire-by-index over the lane
    axis.  `idx` are unique per lane; tie-break = smallest index, exactly
    matching lax.top_k / torch.sort(descending) ordering.
    vals: (R, W) f32, idx: (R, W) i32  ->  ((R, k), (R, k))."""
    neg = jnp.float32(-jnp.inf)
    out_v, out_i = [], []
    c, ix = vals, idx
    for _ in range(k):
        m = jnp.max(c, axis=-1, keepdims=True)
        a = jnp.min(jnp.where(c == m, ix, big), axis=-1, keepdims=True)
        out_v.append(m)
        out_i.append(a)
        picked = ix == a                       # retire by index, not by value
        c = jnp.where(picked, neg, c)
        ix = jnp.where(picked, big, ix)
    return jnp.concatenate(out_v, axis=-1), jnp.concatenate(out_i, axis=-1)


# ----------------------------------------------------------------------------
# Kernel 1: log_softmax(logits / temperature, axis=-1)   (row-tiled, pipelined)
# ----------------------------------------------------------------------------
def _log_softmax_kernel(x_ref, o_ref, *, inv_temp):
    x = x_ref[...].astype(jnp.float32) * inv_temp
    z = x - jnp.max(x, axis=-1, keepdims=True)
    s = jnp.sum(jnp.exp(z), axis=-1, keepdims=True)
    o_ref[...] = (z - jnp.log(s)).astype(o_ref.dtype)


def pallas_log_softmax(logits, temperature=1.0, out_dtype=jnp.bfloat16):
    """Internal math is f32; the stored (N,V) result defaults to bf16 (HBM-bound
    kernel -> writeback is half the traffic).  Pass out_dtype=jnp.float32 for
    bit-exact parity with the torch reference."""
    n, v = logits.shape
    tile = _row_tile(n, v)
    out_bytes = jnp.dtype(out_dtype).itemsize
    kern = functools.partial(_log_softmax_kernel, inv_temp=float(1.0 / temperature))
    cost = pl.CostEstimate(flops=5 * n * v, transcendentals=n * v + n,
                           bytes_accessed=n * v * (4 + out_bytes))
    return pl.pallas_call(
        kern,
        out_shape=jax.ShapeDtypeStruct((n, v), out_dtype),
        grid=(n // tile,),
        in_specs=[pl.BlockSpec((tile, v), lambda i: (i, 0))],
        out_specs=pl.BlockSpec((tile, v), lambda i: (i, 0)),
        compiler_params=pltpu.CompilerParams(
            dimension_semantics=("parallel",),
            vmem_limit_bytes=_VMEM_LIMIT),
        cost_estimate=cost,
    )(logits)


# ----------------------------------------------------------------------------
# Kernel 2: FUSED greedy sample_next_word from raw logits
#   it  = argmax(logits)                      (monotone under /T)
#   val = log_softmax(logits/T)[it] = -log(sum exp(x - max x)),  x = logits/T
# Optionally also emits the full log-prob matrix (single HBM read / launch).
# ----------------------------------------------------------------------------
def _greedy_kernel(x_ref, *o_refs, inv_temp, with_lp):
    if with_lp:
        lp_ref, it_ref, val_ref = o_refs
    else:
        it_ref, val_ref = o_refs
    x = x_ref[...].astype(jnp.float32) * inv_temp            # (T, V)
    m = jnp.max(x, axis=-1, keepdims=True)                   # (T, 1)
    z = x - m
    s = jnp.sum(jnp.exp(z), axis=-1, keepdims=True)
    logs = jnp.log(s)
    if with_lp:
        lp_ref[...] = (z - logs).astype(lp_ref.dtype)
    lane = lax.broadcasted_iota(jnp.int32, x.shape, 1)
    big = jnp.int32(x.shape[-1])
    it_ref[...] = jnp.min(jnp.where(x == m, lane, big), axis=-1, keepdims=True)
    val_ref[...] = -logs


def pallas_greedy_from_logits(logits, temperature=1.0, return_logprobs=False,
                              lp_dtype=jnp.bfloat16):
    n, v = logits.shape
    tile = _row_tile(n, v)
    kern = functools.partial(_greedy_kernel, inv_temp=float(1.0 / temperature),
                             with_lp=return_logprobs)
    out_shape, out_specs = [], []
    bytes_out = n * 8
    if return_logprobs:
        out_shape.append(jax.ShapeDtypeStruct((n, v), lp_dtype))
        out_specs.append(pl.BlockSpec((tile, v), lambda i: (i, 0)))
        bytes_out += n * v * jnp.dtype(lp_dtype).itemsize
    out_shape += [jax.ShapeDtypeStruct((n, 1), jnp.int32),
                  jax.ShapeDtypeStruct((n, 1), jnp.float32)]
    out_specs += [pl.BlockSpec((tile, 1), lambda i: (i, 0)),
                  pl.BlockSpec((tile, 1), lambda i: (i, 0))]
    cost = pl.CostEstimate(flops=6 * n * v, transcendentals=n * v + n,
                           bytes_accessed=n * v * 4 + bytes_out)
    results = pl.pallas_call(
        kern,
        out_shape=tuple(out_shape),
        grid=(n // tile,),
        in_specs=[pl.BlockSpec((tile, v), lambda i: (i, 0))],
        out_specs=tuple(out_specs),
        compiler_params=pltpu.CompilerParams(
            dimension_semantics=("parallel",),
            vmem_limit_bytes=_VMEM_LIMIT),
        cost_estimate=cost,
    )(logits)
    if return_logprobs:
        lp, it, vals = results
        return it[:, 0], vals[:, 0], lp
    it, vals = results
    return it[:, 0], vals[:, 0]


# ----------------------------------------------------------------------------
# Kernel 3: FUSED beam_step
#   lp   = log_softmax(logits/T, -1)                       (also an output)
#   cand = beam_logprobs_sum[:, :, None] + lp
#   ys, ix = top_k(cand.reshape(B, -1), beam_size);  beam_ix = ix // V;  tok = ix % V
#
# Stage 1: single streaming pass over the vocab in 1024-lane chunks; each chunk
#          contributes its per-beam top-K which is merged into a small running
#          (value, index) candidate set -> only ~1 pass of VMEM traffic over the
#          (rows, V) data (vs. 4K+1 passes for a K-iteration retire loop).
# Stage 2: per batch item, merge the tiny (beam*K) survivor set with flat-index
#          tie-breaking (exactly matches lax.top_k / torch.sort ordering) and
#          emit each (1, K) result with a single store.
# ----------------------------------------------------------------------------
def _beam_step_kernel(x_ref, sum_ref, lp_ref, ys_ref, bix_ref, tok_ref,
                      *, beam_size, bin_in, n_batch, inv_temp, vocab, chunk):
    x = x_ref[...].astype(jnp.float32) * inv_temp            # (R, V), R = n_batch*bin_in
    m = jnp.max(x, axis=-1, keepdims=True)
    z = x - m
    lp = z - jnp.log(jnp.sum(jnp.exp(z), axis=-1, keepdims=True))
    lp_ref[...] = lp.astype(lp_ref.dtype)                    # bf16 writeback by default

    sums = sum_ref[...].astype(jnp.float32)                  # (R, 1)  (tiny VMEM block)
    K = beam_size
    big_tok = jnp.int32(vocab)
    neg = jnp.float32(-jnp.inf)

    # --- stage 1: streaming per-beam top-K over the vocab --------------------
    run_v = run_i = None
    off = 0
    while off < vocab:                                        # static (trace-time) loop
        w = min(chunk, vocab - off)
        cand = lp[:, off:off + w] + sums                      # (R, w) candidate scores
        lane = lax.broadcasted_iota(jnp.int32, cand.shape, 1) + off
        cv, ci = _topk_lane(cand, lane, min(K, w), big_tok)
        if run_v is None:
            run_v, run_i = cv, ci
        else:
            run_v, run_i = _topk_lane(jnp.concatenate([run_v, cv], axis=-1),
                                      jnp.concatenate([run_i, ci], axis=-1),
                                      K, big_tok)
        off += w

    # --- stage 2: merge the tiny (bin_in, K) survivor set per batch item -----
    big_flat = jnp.int32(bin_in * vocab)
    for bi in range(n_batch):
        rs = slice(bi * bin_in, (bi + 1) * bin_in)
        v_b = run_v[rs]                                       # (bin_in, K)
        beam_id = lax.broadcasted_iota(jnp.int32, v_b.shape, 0)
        f_b = beam_id * vocab + run_i[rs]                     # global flat index
        ys_k, bx_k, tk_k = [], [], []
        c, ix = v_b, f_b
        for _ in range(K):
            mk = jnp.max(c, axis=(0, 1), keepdims=True)                       # (1, 1)
            ak = jnp.min(jnp.where(c == mk, ix, big_flat), axis=(0, 1), keepdims=True)
            ys_k.append(mk)
            bx_k.append(ak // vocab)
            tk_k.append(ak % vocab)
            picked = ix == ak                                 # retire by flat index
            c = jnp.where(picked, neg, c)
            ix = jnp.where(picked, big_flat, ix)
        # single (1, K) store per output per batch item
        ys_ref[bi:bi + 1, :] = jnp.concatenate(ys_k, axis=-1)
        bix_ref[bi:bi + 1, :] = jnp.concatenate(bx_k, axis=-1)
        tok_ref[bi:bi + 1, :] = jnp.concatenate(tk_k, axis=-1)


def pallas_beam_step(logits, beam_logprobs_sum, beam_size, temperature=1.0,
                     lp_dtype=jnp.bfloat16, chunk=_TOPK_CHUNK):
    """logits: (B*Bin, V) raw decoder logits; beam_logprobs_sum: (B, Bin).
    Returns (logprobs (B*Bin, V), ys (B,K), beam_ix (B,K), selected_ix (B,K))."""
    b, bin_in = beam_logprobs_sum.shape
    n, v = logits.shape
    assert n == b * bin_in
    assert beam_size <= min(v, chunk), "beam_size must fit inside one vocab chunk"
    assert bin_in * v < 2 ** 31, "int32 flat candidate index would overflow"

    bpb = _beam_batches_per_block(b, bin_in)   # batch items per block (fills sublanes)
    g = b // bpb
    rows = bpb * bin_in

    x3 = logits.reshape(g, rows, v)
    sums3 = beam_logprobs_sum.astype(jnp.float32).reshape(g, rows, 1)
    # NOTE: the (rows,1) sums block pads to one (8,128) tile; kept in VMEM (not
    # SMEM scalar prefetch) for lowering robustness -- it is a few KB per step.

    kern = functools.partial(_beam_step_kernel, beam_size=beam_size,
                             bin_in=bin_in, n_batch=bpb,
                             inv_temp=float(1.0 / temperature),
                             vocab=v, chunk=chunk)
    lp_bytes = jnp.dtype(lp_dtype).itemsize
    cost = pl.CostEstimate(flops=n * v * (8 + 2 * beam_size),
                           transcendentals=n * v + n,
                           bytes_accessed=n * v * (4 + lp_bytes) + n * 4
                           + b * beam_size * 12)
    lp, ys, bix, tok = pl.pallas_call(
        kern,
        out_shape=(
            jax.ShapeDtypeStruct((g, rows, v), lp_dtype),
            jax.ShapeDtypeStruct((g, bpb, beam_size), jnp.float32),
            jax.ShapeDtypeStruct((g, bpb, beam_size), jnp.int32),
            jax.ShapeDtypeStruct((g, bpb, beam_size), jnp.int32),
        ),
        grid=(g,),
        in_specs=[
            pl.BlockSpec((None, rows, v), lambda i: (i, 0, 0)),
            pl.BlockSpec((None, rows, 1), lambda i: (i, 0, 0)),
        ],
        out_specs=(
            pl.BlockSpec((None, rows, v), lambda i: (i, 0, 0)),
            pl.BlockSpec((None, bpb, beam_size), lambda i: (i, 0, 0)),
            pl.BlockSpec((None, bpb, beam_size), lambda i: (i, 0, 0)),
            pl.BlockSpec((None, bpb, beam_size), lambda i: (i, 0, 0)),
        ),
        compiler_params=pltpu.CompilerParams(
            dimension_semantics=("parallel",),
            vmem_limit_bytes=_VMEM_LIMIT),
        cost_estimate=cost,
    )(x3, sums3)
    return (lp.reshape(n, v), ys.reshape(b, beam_size),
            bix.reshape(b, beam_size), tok.reshape(b, beam_size))


# ----------------------------------------------------------------------------
# Thin wrapper mirroring CaptionModel's `forward -> getattr(self, '_'+mode)`
# dispatch.  CaptionModel has no learnable parameters, so nothing to init.
# ----------------------------------------------------------------------------
class CaptionModelPallas:
    def __init__(self, beam_size=4, temperature=1.0, logprob_dtype=jnp.bfloat16):
        self.beam_size = beam_size
        self.temperature = temperature
        # Dtype for the full-width (N,V) log-prob writebacks; internal math is
        # always f32.  Use jnp.float32 for bit-exact parity with torch.
        self.logprob_dtype = logprob_dtype
        # TODO(synk): beam_search host-side bookkeeping (beam_seq gathers, state
        # re-indexing, diversity scatter_add, done-beam collection, length
        # penalty) stays in Python/JAX control flow; only the per-step math is
        # implemented as Pallas kernels here.

    def forward(self, *args, **kwargs):
        mode = kwargs.pop("mode", "forward")
        return getattr(self, "_" + mode)(*args, **kwargs)

    # F.log_softmax(logits / temperature, dim=-1)
    def _log_softmax(self, logits):
        return pallas_log_softmax(logits, self.temperature,
                                  out_dtype=self.logprob_dtype)

    # sample_next_word(logprobs, 'greedy', T) fused with the preceding
    # log_softmax: takes RAW logits; optionally also emits the full logprobs in
    # the same pass (one launch, one HBM read of the logits).
    def _sample_next_word(self, logits, sample_method="greedy",
                          return_logprobs=False):
        assert sample_method == "greedy"
        # TODO(synk): 'gumbel' / 'top-k' / 'top-p' categorical sampling branches
        # are RNG/distribution host paths and are not Pallas kernels here.
        return pallas_greedy_from_logits(logits, self.temperature,
                                         return_logprobs=return_logprobs,
                                         lp_dtype=self.logprob_dtype)

    # core of beam_step fused with log_softmax; also returns the logprobs the
    # beam bookkeeping needs, so no separate log_softmax pallas_call is required.
    def _beam_step(self, logits, beam_logprobs_sum):
        return pallas_beam_step(logits, beam_logprobs_sum, self.beam_size,
                                self.temperature, lp_dtype=self.logprob_dtype)


# ----------------------------------------------------------------------------
if __name__ == "__main__":
    key = jax.random.PRNGKey(0)
    k1, k2 = jax.random.split(key)

    batch_size = 4
    beam_size = 4
    vocab_plus_1 = 1536   # > one 1024-lane chunk -> exercises the streaming merge
    temperature = 1.0

    model = CaptionModelPallas(beam_size=beam_size, temperature=temperature)

    # raw decoder logits for batch*beam rows
    logits = jax.random.normal(k1, (batch_size * beam_size, vocab_plus_1), jnp.float32)
    ref_lp = jax.nn.log_softmax(logits / temperature, axis=-1)

    # 1a) log-softmax kernel, f32 writeback (exact check vs reference)
    lp_f32 = pallas_log_softmax(logits, temperature, out_dtype=jnp.float32)
    jax.block_until_ready(lp_f32)
    np.testing.assert_allclose(np.asarray(lp_f32), np.asarray(ref_lp),
                               rtol=1e-5, atol=1e-5)

    # 1b) default bandwidth-optimized bf16 writeback
    lp_bf16 = model.forward(logits, mode="log_softmax")
    jax.block_until_ready(lp_bf16)
    np.testing.assert_allclose(np.asarray(lp_bf16, dtype=np.float32),
                               np.asarray(ref_lp), rtol=2e-2, atol=2e-2)

    # 2) fused greedy sample_next_word kernel (from raw logits)
    it, sample_lp = model.forward(logits, mode="sample_next_word")
    jax.block_until_ready(it)
    np.testing.assert_array_equal(np.asarray(it),
                                  np.asarray(jnp.argmax(ref_lp, axis=-1)))
    np.testing.assert_allclose(np.asarray(sample_lp),
                               np.asarray(jnp.max(ref_lp, axis=-1)),
                               rtol=1e-5, atol=1e-5)

    # 2b) fused greedy + full logprobs in a single pass
    it2, sample_lp2, lp2 = model.forward(logits, mode="sample_next_word",
                                         return_logprobs=True)
    jax.block_until_ready(it2)
    np.testing.assert_array_equal(np.asarray(it2), np.asarray(it))
    np.testing.assert_allclose(np.asarray(sample_lp2), np.asarray(sample_lp),
                               rtol=1e-6, atol=1e-6)
    np.testing.assert_allclose(np.asarray(lp2, dtype=np.float32),
                               np.asarray(ref_lp), rtol=2e-2, atol=2e-2)

    # 3) fused beam_step kernel (t > 0 case: beam_size incoming beams)
    beam_logprobs_sum = jax.random.normal(k2, (batch_size, beam_size), jnp.float32)
    lp_out, ys, beam_ix, selected_ix = model.forward(
        logits, beam_logprobs_sum, mode="beam_step")
    jax.block_until_ready(ys)

    np.testing.assert_allclose(np.asarray(lp_out, dtype=np.float32),
                               np.asarray(ref_lp), rtol=2e-2, atol=2e-2)
    cand = (beam_logprobs_sum[:, :, None]
            + ref_lp.reshape(batch_size, beam_size, vocab_plus_1))
    ref_ys, ref_ix = lax.top_k(cand.reshape(batch_size, -1), beam_size)
    np.testing.assert_allclose(np.asarray(ys), np.asarray(ref_ys),
                               rtol=1e-5, atol=1e-5)
    np.testing.assert_array_equal(np.asarray(beam_ix),
                                  np.asarray(ref_ix // vocab_plus_1))
    np.testing.assert_array_equal(np.asarray(selected_ix),
                                  np.asarray(ref_ix % vocab_plus_1))

    print("KERNEL_OK")
</pallas_src>

<mosaic_0001>
module attributes {stable_mosaic.version = 11 : i64} {
  func.func @_log_softmax_kernel(%arg0: i32, %arg1: memref<8x1536xf32, #tpu.memory_space<vmem>>, %arg2: memref<8x1536xf32, #tpu.memory_space<vmem>>) attributes {dimension_semantics = [#tpu.dimension_semantics<parallel>], iteration_bounds = array<i64: 2>, scalar_prefetch = 0 : i64, scratch_operands = 0 : i64, tpu.core_type = #tpu.core_type<tc>, window_params = [{transform_indices = @transform_0, window_bounds = array<i64: 8, 1536>}, {transform_indices = @transform_1, window_bounds = array<i64: 8, 1536>}]} {
    %c0 = arith.constant 0 : index
    %c0_0 = arith.constant 0 : index
    %0 = vector.load %arg1[%c0, %c0_0] : memref<8x1536xf32, #tpu.memory_space<vmem>>, vector<8x1536xf32>
    %cst = arith.constant 1.000000e+00 : f32
    %1 = vector.broadcast %cst : f32 to vector<8x1536xf32>
    %2 = arith.mulf %0, %1 : vector<8x1536xf32>
    %cst_1 = arith.constant dense<0xFF800000> : vector<8xf32>
    %3 = vector.multi_reduction <maximumf>, %2, %cst_1 [1] : vector<8x1536xf32> to vector<8xf32>
    %4 = vector.shape_cast %3 : vector<8xf32> to vector<8x1xf32>
    %5 = vector.broadcast %4 : vector<8x1xf32> to vector<8x1536xf32>
    %6 = arith.subf %2, %5 : vector<8x1536xf32>
    %7 = math.exp %6 : vector<8x1536xf32>
    %cst_2 = arith.constant dense<0.000000e+00> : vector<8xf32>
    %8 = vector.multi_reduction <add>, %7, %cst_2 [1] : vector<8x1536xf32> to vector<8xf32>
    %9 = vector.shape_cast %8 : vector<8xf32> to vector<8x1xf32>
    %10 = math.log %9 : vector<8x1xf32>
    %11 = vector.broadcast %10 : vector<8x1xf32> to vector<8x1536xf32>
    %12 = arith.subf %6, %11 : vector<8x1536xf32>
    %c0_3 = arith.constant 0 : index
    %c0_4 = arith.constant 0 : index
    %13 = vector.load %arg2[%c0_3, %c0_4] : memref<8x1536xf32, #tpu.memory_space<vmem>>, vector<8x1536xf32>
    tpu.vector_store %arg2[%c0_3, %c0_4], %12 {strides = array<i32>} : memref<8x1536xf32, #tpu.memory_space<vmem>>, vector<8x1536xf32>,
    return
  }
  func.func @transform_0(%arg0: i32) -> (i32, i32) {
    %c0_i32 = arith.constant 0 : i32
    %c0_i32_0 = arith.constant 0 : i32
    return %arg0, %c0_i32 : i32, i32
  }
  func.func @transform_1(%arg0: i32) -> (i32, i32) {
    %c0_i32 = arith.constant 0 : i32
    %c0_i32_0 = arith.constant 0 : i32
    return %arg0, %c0_i32 : i32, i32
  }
}

</mosaic_0001>

<bundles_post_ra>
// kernel: tpu_custom_call.1
= control target key start
LH: loop header
LB: loop body
LE: loop exit
PB: predicated region body
PF: predicated region fallthrough
CT: control target
= control target key end

     0   :  { %6 = vsyncpa [#allocation3], 0  ;;  %s701_s0 = inlined_call_operand.hbm [shape: f32[16,1536], index: 0, kind: input, shape index: {}]   ;;  %s702_s1 = inlined_call_operand.hbm [shape: f32[16,1536], index: 1, kind: output, shape index: {}]  }
   0x1   :  { %8 = vsyncpa [#allocation3 + $0x1], 0 }
   0x2   :  { %9 = vsyncpa [#allocation4], 0 }
   0x3   :  { %11 = vsyncpa [#allocation4 + $0x1], 0  ;;  %s508_s6 = smov 0   ;;  %s510_s7 = smov 0  }
   0x4   :  { %s512_s8 = smov 0   ;;  %s514_s9 = smov 0  }
   0x5 LB: > { %s529_s10 = sadd.s32 4294967295, %s494_s9   ;;  %s318_s11 = sadd.s32 4294967294, %s494_s9   ;;  %s494_s9 = sphi %s514_s9, %s718_s9   ;;  %s490_s8 = sphi %s512_s8, %s717_s8   ;;  %s486_s7 = sphi %s510_s7, %s716_s7   ;;  %s482_s6 = sphi %s508_s6, %s715_s6  }
   0x6   : > { %s533_s12 = sadd.s32 1, %s494_s9   ;;  %s24_s13 = sadd.s32 1, %s490_s8 }
   0x7   : > { %s21_s14 = ssub.s32 %s494_s9, %s533_s12  ;;  %p31_p0 = scmp.ne.s32.totalorder %s490_s8, %s486_s7 }
   0x8   : > { %p22_p1 = scmp.eq.s32.totalorder %s21_s14, 0  ;;  %p32_p2 = scmp.eq.s32.totalorder %s494_s9, 0 }
   0x9   : > { %p37_p3 = scmp.ne.s32.totalorder %s486_s7, %s482_s6  ;;  %p38_p4 = scmp.eq.s32.totalorder %s529_s10, 0 }
   0xa   : > { %s545_s15 = scalar_select %p22_p1, %s490_s8, %s24_s13  }
   0xb   : > { %p33_p5 = por %p32_p2, %p31_p0  ;;  %p547_p6 = por %p38_p4, %p37_p3 }
   0xc   : > { %p61_p7 = scmp.eq.s32.totalorder %s529_s10, 1  ;;  %p67_p8 = scmp.eq.s32.totalorder %s318_s11, 1 }
   0xd   : > { %s705_s16 = scalar_select %p547_p6, 1, 0 }
   0xe   : > { %p342_p10 = scmp.lt.s32.totalorder %s494_s9, 2  ;;  %p554_p11 = por %p61_p7, %p31_p0 }
   0xf   : > { %p558_p12 = por %p67_p8, %p37_p3  ;;  %s87_s19 = sand.u32 1, %s490_s8  }
  0x10   : > { %s706_s17 = scalar_select %p554_p11, 1, 0 }
  0x11   : > { %s707_s18 = scalar_select %p558_p12, 1, 0 }
  0x12   : > { %s327_s20 = smul.u32 1536, %s494_s9  ;;  %p569_p13 = pnand %p342_p10, %p33_p5 }
  0x13   : > { %s326_s21 = smul.u32 96, %s87_s19  ;;  %s88_s28 = scalar_lea.sflag [#allocation3], %s87_s19 }
  0x14   : > { %s567_s24 = scalar_lea.hbm %s701_s0, %s327_s20  ;;  %p404_p3 = pneg %p569_p13 }
  0x15   : > { %s91_s26 = scalar_lea.vmem [#allocation2], %s326_s21  ;;  %s402_s29 = scalar_lea.hbm %s567_s24, 1536 }
  0x16   : > { %s99_s27 = sshll.u32 %s91_s26, 4  ;;  %p403_p2 = scmp.ne.s32.totalorder %s567_s24, %s402_s29  ;;  %s100_s27 = int_to_ptr.vmem [resolvable:$true] %s99_s27 }
  0x17   : > { %s407_s3 = scalar_lea.hbm %s701_s0, 3072  ;;  %p408_p5 = scmp.lt.s32.totalorder %s567_s24, %s701_s0 }
  0x18   : > { %p405_p4 = pnand %p404_p3, %p403_p2  ;;  %p409_p8 = scmp.lt.s32.totalorder %s407_s3, %s402_s29 }
  0x1a   : > { %p406_p7 = pneg %p405_p4  ;;  %p410_p10 = por %p409_p8, %p408_p5 }
  0x1c   : > { %p411_p9 = pnand %p410_p10, %p406_p7 }
  0x1e   : > { %414 = shalt.err (!%p411_p9)
}
  0x1f   : > { %s415_s11 = scalar_lea.vmem %s100_s27, 1536  ;;  %s496_s13 = smov [#allocation2]  }
  0x20   : > { %p416_p0 = scmp.ne.s32.totalorder %s100_s27, %s415_s11  ;;  %s420_s14 = sshll.u32 %s496_s13, 4  ;;  %s421_s14 = int_to_ptr.vmem [resolvable:$false] %s420_s14 }
  0x21   : > { %s422_s19 = scalar_lea.vmem %s421_s14, 3072  ;;  %p423_p2 = scmp.lt.s32.totalorder %s100_s27, %s421_s14 }
  0x22   : > { %p418_p1 = pnand %p416_p0, %p404_p3  ;;  %p424_p4 = scmp.lt.s32.totalorder %s422_s19, %s415_s11 }
  0x24   : > { %p419_p12 = pneg %p418_p1  ;;  %p425_p11 = por %p424_p4, %p423_p2 }
  0x26   : > { %p426_p6 = pnand %p425_p11, %p419_p12 }
  0x28   : > { %429 = shalt.err (!%p426_p6)
}
  0x29   : > { %337 = dma.hbm_to_vmem [thread:$0]  (!%p569_p13), %s567_s24, 1536, %s100_s27, %s88_s28  }
  0x2a   : > { %p709_p9 = scmp.lt.s32.totalorder %s494_s9, 3  ;;  %p710_p7 = scmp.ge.s32.totalorder %s494_s9, 1 }
  0x2c   : > { %p105_p5 = pnand %p710_p7, %p709_p9 }
  0x2d   : > { %s594_s20 = sand.u32 (!%p105_p5), 1, %s486_s7   ;;  %p711_p6 = scmp.ne.s32.totalorder (!%p105_p5), %s705_s16, 0 }
  0x2e   : > { %108 = sbr.rel (%p105_p5) target bundleno = 417 (0x1a1), region = 24  ;;  %s111_s22 = scalar_lea.sflag (!%p105_p5), [#allocation3], %s594_s20 }
  0x2f   : > { %s328_s21 = smul.u32 (!%p105_p5), 96, %s594_s20 }
  0x31   : > { %s114_s23 = scalar_lea.vmem (!%p105_p5), [#allocation2], %s328_s21 }
  0x33   : > { %473 = dma.done.wait (%p711_p6), %s111_s22, 1536  }
  0x34   : > { %475 = vsyncadd (%p711_p6), %s111_s22, 4294965760  ;;  %v133_v0 = vld [vmem:[%s114_s23] sm:$0xff]  ;;  %v134_v1 = vld [vmem:[%s114_s23 + $0x8] sm:$0xff]  ;;  %s329_s16 = smul.u32 1536, %s529_s10  ;;  %s132_s24 = scalar_lea.vmem [#allocation5], %s328_s21 }
  0x35   : > { %v135_v2 = vld [vmem:[%s114_s23 + $0x10] sm:$0xff]  ;;  %v136_v3 = vld [vmem:[%s114_s23 + $0x18] sm:$0xff]  ;;  %v137_v4 = vld [vmem:[%s114_s23 + $0x20] sm:$0xff]  ;;  %s248_s25 = sshll.u32 %s132_s24, 4  ;;  %s234_s28 = scalar_lea.sflag [#allocation4], %s594_s20  ;;  %s660_s25 = int_to_ptr.vmem [resolvable:$true] %s248_s25 }
  0x36   : > { %v138_v5 = vld [vmem:[%s114_s23 + $0x28] sm:$0xff]  ;;  %v139_v6 = vld [vmem:[%s114_s23 + $0x30] sm:$0xff]  ;;  %v140_v7 = vld [vmem:[%s114_s23 + $0x38] sm:$0xff]  ;;  %v145_v9 = vmax.f32 %v133_v0, %v137_v4  ;;  %s658_s27 = scalar_lea.hbm %s702_s1, %s329_s16  ;;  %s430_s29 = scalar_lea.vmem %s660_s25, 1536 }
  0x37   : > { %v141_v8 = vld [vmem:[%s114_s23 + $0x40] sm:$0xff]  ;;  %v146_v10 = vmax.f32 %v134_v1, %v138_v5  ;;  %v142_v11 = vld [vmem:[%s114_s23 + $0x48] sm:$0xff]  ;;  %v143_v12 = vld [vmem:[%s114_s23 + $0x50] sm:$0xff]  ;;  %v147_v14 = vmax.f32 %v135_v2, %v139_v6  ;;  %v148_v15 = vmax.f32 %v136_v3, %v140_v7  ;;  %p431_p11 = scmp.ne.s32.totalorder %s660_s25, %s430_s29  ;;  %p712_p12 = scmp.ne.s32.totalorder %s706_s17, 0 }
  0x38   : > { %v144_v13 = vld [vmem:[%s114_s23 + $0x58] sm:$0xff]  ;;  %v149_v16 = vmax.f32 %v145_v9, %v141_v8  ;;  %s497_s30 = smov [#allocation5]  }
  0x39   : > { %v150_v17 = vmax.f32 %v146_v10, %v142_v11  ;;  %v151_v18 = vmax.f32 %v147_v14, %v143_v12  ;;  %v152_v19 = vmax.f32 %v148_v15, %v144_v13  ;;  %p432_p13 = pnand %p431_p11, %p712_p12  ;;  %s434_s2 = sshll.u32 %s497_s30, 4  ;;  %s435_s2 = int_to_ptr.vmem [resolvable:$false] %s434_s2 }
  0x3a   : > { %s436_s3 = scalar_lea.vmem %s435_s2, 3072  ;;  %p437_p1 = scmp.lt.s32.totalorder %s660_s25, %s435_s2 }
  0x3b   : > { %v153_v20 = vmax.f32 %v149_v16, %v150_v17  ;;  %v154_v21 = vmax.f32 %v151_v18, %v152_v19  ;;  %p433_p0 = pneg %p432_p13  ;;  %p438_p3 = scmp.lt.s32.totalorder %s436_s3, %s430_s29 }
  0x3d   : > { %v155_v22 = vmax.f32 %v153_v20, %v154_v21  ;;  %p439_p8 = por %p438_p3, %p437_p1 }
  0x3f   : > { %156 = vmax.xlane.f32.xlu0 %v155_v22  ;;  %p440_p10 = pnand %p439_p8, %p433_p0 }
  0xc8   : > { %v157_v23 = vpop.xlane.xlu0 %156 }
  0xc9   : > { %v604_v24 = vsub.f32 %v133_v0, %v157_v23  ;;  %v606_v25 = vsub.f32 %v134_v1, %v157_v23  ;;  %v608_v26 = vsub.f32 %v135_v2, %v157_v23  ;;  %v610_v27 = vsub.f32 %v136_v3, %v157_v23 }
  0xca   : > { %v614_v30 = vsub.f32 %v137_v4, %v157_v23  ;;  %v617_v32 = vsub.f32 %v138_v5, %v157_v23  ;;  %v620_v34 = vsub.f32 %v139_v6, %v157_v23  ;;  %v623_v36 = vsub.f32 %v140_v7, %v157_v23 }
  0xcb   : > { %v170_v28 = vmul.f32 1.442695, %v604_v24  ;;  %v172_v29 = vmul.f32 1.442695, %v606_v25  ;;  %v174_v31 = vmul.f32 1.442695, %v608_v26  ;;  %v626_v38 = vsub.f32 %v141_v8, %v157_v23 }
  0xcc   : > { %v176_v33 = vmul.f32 1.442695, %v610_v27  ;;  %v178_v35 = vmul.f32 1.442695, %v614_v30  ;;  %v180_v37 = vmul.f32 1.442695, %v617_v32  ;;  %v629_v40 = vsub.f32 %v142_v11, %v157_v23 }
  0xcd   : > { %376 = vpow2.f32 %v170_v28  ;;  %v182_v39 = vmul.f32 1.442695, %v620_v34  ;;  %v184_v41 = vmul.f32 1.442695, %v623_v36  ;;  %v632_v42 = vsub.f32 %v143_v12, %v157_v23 }
  0xce   : > { %378 = vpow2.f32 %v172_v29  ;;  %v186_v43 = vmul.f32 1.442695, %v626_v38  ;;  %v635_v45 = vsub.f32 %v144_v13, %v157_v23  ;;  %v188_v46 = vmul.f32 1.442695, %v629_v40 }
  0xcf   : > { %380 = vpow2.f32 %v174_v31  ;;  %v190_v48 = vmul.f32 1.442695, %v632_v42 }
  0xd0   : > { %382 = vpow2.f32 %v176_v33  ;;  %v192_v51 = vmul.f32 1.442695, %v635_v45 }
  0xd1   : > { %384 = vpow2.f32 %v178_v35 }
  0xd2   : > { %386 = vpow2.f32 %v180_v37 }
  0xd3   : > { %388 = vpow2.f32 %v182_v39 }
  0xd4   : > { %390 = vpow2.f32 %v184_v41 }
  0xd5   : > { %392 = vpow2.f32 %v186_v43 }
  0xd6   : > { %394 = vpow2.f32 %v188_v46 }
  0xd7   : > { %396 = vpow2.f32 %v190_v48 }
  0xd8   : > { %398 = vpow2.f32 %v192_v51 }
  0xda   : > { %v377_v44 = vpop.eup %376 }
  0xdb   : > { %v379_v47 = vpop.eup %378 }
  0xdc   : > { %v194_v49 = vadd.f32 %v379_v47, %v377_v44  ;;  %v381_v50 = vpop.eup %380 }
  0xdd   : > { %v383_v53 = vpop.eup %382 }
  0xde   : > { %v195_v52 = vadd.f32 %v381_v50, %v194_v49  ;;  %v385_v55 = vpop.eup %384 }
  0xdf   : > { %v387_v57 = vpop.eup %386 }
  0xe0   : > { %v196_v54 = vadd.f32 %v383_v53, %v195_v52  ;;  %v389_v59 = vpop.eup %388 }
  0xe1   : > { %v391_v61 = vpop.eup %390 }
  0xe2   : > { %v197_v56 = vadd.f32 %v385_v55, %v196_v54  ;;  %v393_v63 = vpop.eup %392 }
  0xe3   : > { %v395_v1 = vpop.eup %394 }
  0xe4   : > { %v198_v58 = vadd.f32 %v387_v57, %v197_v56  ;;  %v397_v3 = vpop.eup %396 }
  0xe5   : > { %v399_v5 = vpop.eup %398 }
  0xe6   : > { %v199_v60 = vadd.f32 %v389_v59, %v198_v58 }
  0xe8   : > { %v200_v62 = vadd.f32 %v391_v61, %v199_v60 }
  0xea   : > { %v201_v0 = vadd.f32 %v393_v63, %v200_v62 }
  0xec   : > { %v202_v2 = vadd.f32 %v395_v1, %v201_v0 }
  0xee   : > { %v203_v4 = vadd.f32 %v397_v3, %v202_v2 }
  0xf0   : > { %v204_v6 = vadd.f32 %v399_v5, %v203_v4 }
  0xf2   : > { %205 = vadd.xlane.f32.xlu0 %v204_v6 }
 0x17b   : > { %v206_v7 = vpop.xlane.xlu0 %205 }
 0x17c   : > { %400 = vlog2.f32 %v206_v7 }
 0x189   : > { %v401_v8 = vpop.eup %400 }
 0x18a   : > { %v208_v9 = vmul.f32 0.6931472, %v401_v8 }
 0x18c   : > { %v209_v10 = vsub.f32 %v604_v24, %v208_v9  ;;  %v210_v11 = vsub.f32 %v606_v25, %v208_v9  ;;  %v211_v12 = vsub.f32 %v608_v26, %v208_v9  ;;  %v212_v13 = vsub.f32 %v610_v27, %v208_v9 }
 0x18d   : > { %v213_v14 = vsub.f32 %v614_v30, %v208_v9  ;;  %v214_v15 = vsub.f32 %v617_v32, %v208_v9  ;;  %v215_v16 = vsub.f32 %v620_v34, %v208_v9  ;;  %v216_v17 = vsub.f32 %v623_v36, %v208_v9 }
 0x18e   : > { %v217_v18 = vsub.f32 %v626_v38, %v208_v9  ;;  %v218_v19 = vsub.f32 %v629_v40, %v208_v9  ;;  %v219_v20 = vsub.f32 %v632_v42, %v208_v9  ;;  %v220_v21 = vsub.f32 %v635_v45, %v208_v9  ;;  %221 = vst [vmem:[%s132_s24] sm:$0xff] %v209_v10 }
 0x18f   : > { %222 = vst [vmem:[%s132_s24 + $0x8] sm:$0xff] %v210_v11  ;;  %223 = vst [vmem:[%s132_s24 + $0x10] sm:$0xff] %v211_v12 }
 0x190   : > { %224 = vst [vmem:[%s132_s24 + $0x18] sm:$0xff] %v212_v13  ;;  %225 = vst [vmem:[%s132_s24 + $0x20] sm:$0xff] %v213_v14 }
 0x191   : > { %226 = vst [vmem:[%s132_s24 + $0x28] sm:$0xff] %v214_v15  ;;  %227 = vst [vmem:[%s132_s24 + $0x30] sm:$0xff] %v215_v16 }
 0x192   : > { %228 = vst [vmem:[%s132_s24 + $0x38] sm:$0xff] %v216_v17  ;;  %229 = vst [vmem:[%s132_s24 + $0x40] sm:$0xff] %v217_v18 }
 0x193   : > { %230 = vst [vmem:[%s132_s24 + $0x48] sm:$0xff] %v218_v19  ;;  %231 = vst [vmem:[%s132_s24 + $0x50] sm:$0xff] %v219_v20 }
 0x194   : > { %232 = vst [vmem:[%s132_s24 + $0x58] sm:$0xff] %v220_v21 }
 0x195   : > { %443 = shalt.err (!%p440_p10)
}
 0x196   : > { %s444_s4 = scalar_lea.hbm %s658_s27, 1536  ;;  %s448_s13 = scalar_lea.hbm %s702_s1, 3072 }
 0x197   : > { %p445_p2 = scmp.ne.s32.totalorder %s658_s27, %s444_s4  ;;  %p449_p7 = scmp.lt.s32.totalorder %s658_s27, %s702_s1 }
 0x198   : > { %p450_p5 = scmp.lt.s32.totalorder %s448_s13, %s444_s4 }
 0x199   : > { %p446_p4 = pnand %p445_p2, %p712_p12 }
 0x19a   : > { %p451_p6 = por %p450_p5, %p449_p7 }
 0x19b   : > { %p447_p9 = pneg %p446_p4 }
 0x19d   : > { %p452_p11 = pnand %p451_p6, %p447_p9 }
 0x19f   : > { %455 = shalt.err (!%p452_p11)
}
 0x1a0   : > { %332 = dma.vmem_to_hbm [thread:$0]  (%p712_p12), %s660_s25, 1536, %s658_s27, %s234_s28  }
 0x1a1 PF: > { %s260_s20 = sand.u32 1, %s482_s6   ;;  %p713_p13 = scmp.ne.s32.totalorder %s707_s18, 0 }
 0x1a2   : > { %p714_p0 = scmp.ge.s32.totalorder %s494_s9, 2  ;;  %s261_s21 = scalar_lea.sflag [#allocation4], %s260_s20 }
 0x1a4   : > { %p339_p1 = pnand %p714_p0, %p713_p13 }
 0x1a6   : > { %p340_p3 = pneg %p339_p1 }
 0x1a8   : > { %477 = dma.done.wait (%p340_p3), %s261_s21, 1536  }
 0x1a9   : > { %479 = vsyncadd (%p340_p3), %s261_s21, 4294965760  ;;  %p14_p8 = scmp.ge.s32.totalorder %s533_s12, 4   ;;  %s715_s6 = smov %s486_s7 }
 0x1aa   : > { %s716_s7 = smov %s490_s8  ;;  %s717_s8 = smov %s545_s15 }
 0x1ab   : > { %s718_s9 = smov %s533_s12  ;;  %16 = sbr.rel (!%p14_p8) target bundleno = 5 (0x5), region = 69 }
 0x1b0   :  { %266 = vsyncpa [#allocation3], 1 }
 0x1b1   :  { %268 = vsyncpa [#allocation3 + $0x1], 1 }
 0x1b2   :  { %269 = vsyncpa [#allocation4], 1 }
 0x1b3   :  { %271 = vsyncpa [#allocation4 + $0x1], 1 }

</bundles_post_ra>
